<compile_context>
chip_gen: v6e
topology: v6e:2x2x1
jax: 0.10.0
libtpu: 0.0.40
codegen_flags: <defaults>
</compile_context>

<pallas_src>
import jax
import jax.numpy as jnp
from jax.experimental import pallas as pl
from jax.experimental.pallas import tpu as pltpu


_LANE = 128
_DEFAULT_VMEM_CAP = 64 * 1024 * 1024  # v7x per-core VMEM (most restrictive gen)


def _round_up(v, m):
    return ((v + m - 1) // m) * m


def _buf_bytes(rows, cols, itemsize):
    """Bytes one VMEM buffer of a (rows, cols) block occupies after (8,128)/(16,128) tiling."""
    sub = 8 * max(1, 4 // itemsize)
    return _round_up(max(rows, 1), sub) * _round_up(max(cols, 1), _LANE) * itemsize


def _vmem_capacity_bytes():
    try:
        return int(pltpu.get_tpu_info().vmem_capacity_bytes)
    except Exception:
        return _DEFAULT_VMEM_CAP


def graph_learning_fused_kernel(x_ref, w_ref, b_ref, o_ref):
    # x_ref: (TB, C*W)  bf16   streamed batch tile
    # w_ref: (C*W, TN)  bf16   fused-weight N-tile (resident over the batch loop)
    # b_ref: (1, TN)    f32    fused-bias N-tile
    # o_ref: (TB, TN)   f32    lane-dense output tile
    out = jnp.dot(x_ref[...], w_ref[...], preferred_element_type=jnp.float32)
    o_ref[...] = (out + b_ref[...]).astype(o_ref.dtype)


def prepare_graph_learning_params(w1, b1, w2, b2, channel, width,
                                  stream_dtype=jnp.bfloat16):
    """Fold conv1+conv2 into one dense layer; pad N (=C*C) to a lane-dense multiple
    of 128. Call ONCE (weights are static).

    w1: (1, W, 1, 1), b1: (1,), w2: (C*C, C, 1, 1), b2: (C*C,)
    Returns: w_eff (C*W, CC_pad) in `stream_dtype`, b_eff (1, CC_pad) float32.
    """
    # TODO(synk): bf16 streaming of x/w_eff changes numerics (bf16 in, f32 acc);
    # pass stream_dtype=jnp.float32 to restore f32-exact behaviour if required.
    C, W = channel, width
    CC = C * C
    CC_pad = _round_up(CC, _LANE)

    w1_v = w1.reshape(W).astype(jnp.float32)                       # (W,)
    w2t = w2.reshape(CC, C).astype(jnp.float32).T                  # (C, CC)
    # W_eff[c*W + w, m] = w1[w] * w2t[c, m]  (matches x.reshape(B, C*W) row-major order)
    w_eff = (w2t[:, None, :] * w1_v[None, :, None]).reshape(C * W, CC)
    b_eff = (b1.reshape(()).astype(jnp.float32) * jnp.sum(w2t, axis=0)
             + b2.reshape(CC).astype(jnp.float32))

    w_eff = jnp.pad(w_eff, ((0, 0), (0, CC_pad - CC))).astype(stream_dtype)
    b_eff = jnp.pad(b_eff, (0, CC_pad - CC)).reshape(1, CC_pad).astype(jnp.float32)
    return w_eff, b_eff


def graph_learning(x, w_eff, b_eff, *, force_pallas=False):
    """x: (B, C, 1, W) NCHW. w_eff: (C*W, CC_pad). b_eff: (1, CC_pad)."""
    B, C, H, W = x.shape
    assert H == 1, "GraphLearning's final reshape implies height == 1 for batched input"
    CW, CC = C * W, C * C
    CC_pad = w_eff.shape[1]
    assert w_eff.shape == (CW, CC_pad) and b_eff.shape == (1, CC_pad) and CC_pad >= CC

    stream_dtype = w_eff.dtype
    x2 = x.reshape(B, CW).astype(stream_dtype)

    # Tiny-problem fast path: a standalone pallas_call is pure overhead here.
    if not force_pallas and B * CW * CC_pad < (1 << 20):
        out = jnp.dot(x2, w_eff, preferred_element_type=jnp.float32) + b_eff
        return out[:, :CC].reshape(B, C, C)

    xb = jnp.dtype(stream_dtype).itemsize
    wb = xb
    vmem_cap = _vmem_capacity_bytes()
    budget = vmem_cap // 2  # leave headroom for compiler scratch / semaphores

    # ---- N tile: stream w_eff blocks when it cannot stay fully resident (v7x 64 MiB).
    TN = CC_pad
    if _buf_bytes(CW, TN, wb) > budget // 2:
        per_lane_block = _buf_bytes(CW, _LANE, wb)
        TN = max(_LANE, ((budget // 2) // max(per_lane_block, 1)) * _LANE)
        TN = min(TN, CC_pad)

    # ---- Batch tile: big tiles (up to 1024 rows) to amortize per-step overhead.
    TB = B if B <= 1024 else 1024
    w_resident_bytes = _buf_bytes(CW, TN, wb)
    while TB > 8 and (3 * _buf_bytes(TB, CW, xb) + 2 * _buf_bytes(TB, TN, 4)
                      > budget - w_resident_bytes):
        TB = max(8, (TB // 2 // 8) * 8)

    nb = pl.cdiv(B, TB)
    nn = pl.cdiv(CC_pad, TN)
    x_bufs = 3 if nb >= 3 else 2

    # Exact (padded) VMEM need, clamped to the chip's capacity.
    need = (x_bufs * _buf_bytes(TB, CW, xb)
            + 1 * _buf_bytes(CW, TN, wb)
            + 1 * _buf_bytes(1, TN, 4)
            + 2 * _buf_bytes(TB, TN, 4))
    vmem_limit = int(min(0.9 * vmem_cap, max(32 << 20, int(1.5 * need) + (4 << 20))))

    # Grid: N-tiles outer, batch inner -> the weight tile stays resident across the
    # whole batch sweep; x streams (double/triple buffered by BlockSpec pipelining).
    grid = (nn, nb)

    def _specs(with_hints):
        def bs(shape, imap, bufs=None):
            if with_hints and bufs is not None:
                return pl.BlockSpec(shape, imap, pipeline_mode=pl.Buffered(bufs))
            return pl.BlockSpec(shape, imap)
        in_specs = [
            bs((TB, CW), lambda j, i: (i, 0), 3 if nb >= 3 else None),  # x: streamed
            bs((CW, TN), lambda j, i: (0, j), 1),                        # w: resident/N-tiled
            bs((1, TN), lambda j, i: (0, j), 1),                         # b: resident/N-tiled
        ]
        out_spec = bs((TB, TN), lambda j, i: (i, j))                     # lane-dense stores
        return in_specs, out_spec

    def _run(with_hints):
        in_specs, out_spec = _specs(with_hints)
        return pl.pallas_call(
            graph_learning_fused_kernel,
            out_shape=jax.ShapeDtypeStruct((B, CC_pad), jnp.float32),
            grid=grid,
            in_specs=in_specs,
            out_specs=out_spec,
            compiler_params=pltpu.CompilerParams(
                # TODO(synk): on v7x, use CORE_PARALLEL (or pl.core_map over a 2-TC
                # mesh) on the batch axis to engage the second TensorCore; plain
                # "parallel" is kept here because it is safe on every generation.
                dimension_semantics=("parallel", "parallel"),
                vmem_limit_bytes=vmem_limit,
            ),
        )(x2, w_eff, b_eff)

    try:
        out = _run(True)
    except Exception:
        # pl.Buffered pipeline hints are optional; fall back if this build rejects them.
        out = _run(False)

    return out[:, :CC].reshape(B, C, C)


def graph_learning_ref(x, w1, b1, w2, b2):
    """Pure-JAX f32 reference with the original two-stage (conv1 -> conv2) semantics."""
    B, C, H, W = x.shape
    w1_v = w1.reshape(W)
    w2_m = w2.reshape(C * C, C)
    z = jnp.einsum("bcw,w->bc", x.reshape(B, C, W), w1_v) + b1[0]   # (B, C)
    out = jnp.einsum("bc,mc->bm", z, w2_m) + b2                     # (B, C*C)
    return out.reshape(B, C, C)


if __name__ == "__main__":
    B, channel, height, width = 2, 4, 1, 16

    key = jax.random.PRNGKey(0)
    kx, kw1, kb1, kw2, kb2, kx2 = jax.random.split(key, 6)

    x = jax.random.normal(kx, (B, channel, height, width), dtype=jnp.float32)
    # conv1: Conv2d(in=width, out=1, 1x1) -> weight (1, W, 1, 1), bias (1,)
    w1 = jax.random.normal(kw1, (1, width, 1, 1), dtype=jnp.float32) * 0.1
    b1 = jax.random.normal(kb1, (1,), dtype=jnp.float32) * 0.1
    # conv2: Conv2d(in=channel, out=channel*channel, 1x1) -> (C*C, C, 1, 1), bias (C*C,)
    w2 = jax.random.normal(kw2, (channel * channel, channel, 1, 1), dtype=jnp.float32) * 0.1
    b2 = jax.random.normal(kb2, (channel * channel,), dtype=jnp.float32) * 0.1

    # Weight folding + lane-dense padding hoisted out of the per-call path.
    w_eff, b_eff = prepare_graph_learning_params(w1, b1, w2, b2, channel, width)

    # Small demo batch: force the Pallas path so the kernel itself is exercised
    # (otherwise the tiny-problem fast path would use plain XLA as the review suggests).
    out = jax.block_until_ready(graph_learning(x, w_eff, b_eff, force_pallas=True))
    ref = graph_learning_ref(x, w1, b1, w2, b2)
    assert out.shape == (B, channel, channel), out.shape
    # bf16-streamed inputs / f32 accumulation => relaxed tolerance vs f32 reference.
    assert jnp.allclose(out, ref, atol=3e-2, rtol=3e-2), "mismatch vs reference (B=2)"

    # Larger batch: exercises the multi-tile batch grid, lane-dense padded stores,
    # the pad-slicing epilogue and the deeper x pipelining path.
    B2 = 4096
    x_big = jax.random.normal(kx2, (B2, channel, height, width), dtype=jnp.float32)
    out_big = jax.block_until_ready(graph_learning(x_big, w_eff, b_eff))
    ref_big = graph_learning_ref(x_big, w1, b1, w2, b2)
    assert out_big.shape == (B2, channel, channel), out_big.shape
    assert jnp.allclose(out_big, ref_big, atol=3e-2, rtol=3e-2), "mismatch vs reference (B=4096)"

    print("KERNEL_OK")
</pallas_src>

<mosaic_0001>
module attributes {stable_mosaic.version = 11 : i64} {
  func.func @graph_learning_fused_kernel(%arg0: i32, %arg1: i32, %arg2: memref<2x64xbf16, #tpu.memory_space<vmem>>, %arg3: memref<64x128xbf16, #tpu.memory_space<vmem>>, %arg4: memref<1x128xf32, #tpu.memory_space<vmem>>, %arg5: memref<2x128xf32, #tpu.memory_space<vmem>>) attributes {dimension_semantics = [#tpu.dimension_semantics<parallel>, #tpu.dimension_semantics<parallel>], iteration_bounds = array<i64: 1, 1>, scalar_prefetch = 0 : i64, scratch_operands = 0 : i64, tpu.core_type = #tpu.core_type<tc>, window_params = [{transform_indices = @transform_0, window_bounds = array<i64: 2, 64>}, {pipeline_mode = #tpu.pipeline_mode<synchronous>, transform_indices = @transform_1, window_bounds = array<i64: 64, 128>}, {pipeline_mode = #tpu.pipeline_mode<synchronous>, transform_indices = @transform_2, window_bounds = array<i64: 1, 128>}, {transform_indices = @transform_3, window_bounds = array<i64: 2, 128>}]} {
    %c0 = arith.constant 0 : index
    %c0_0 = arith.constant 0 : index
    %0 = vector.load %arg2[%c0, %c0_0] : memref<2x64xbf16, #tpu.memory_space<vmem>>, vector<2x64xbf16>
    %c0_1 = arith.constant 0 : index
    %c0_2 = arith.constant 0 : index
    %1 = vector.load %arg3[%c0_1, %c0_2] : memref<64x128xbf16, #tpu.memory_space<vmem>>, vector<64x128xbf16>
    %cst = arith.constant dense<0.000000e+00> : vector<2x128xf32>
    %2 = tpu.matmul %0, %1, %cst {dimension_numbers = #tpu.dot_dimension_numbers<[1], [0], [0], [1], [0, 0, 1, 1], [], []>} : vector<2x64xbf16>, vector<64x128xbf16>, vector<2x128xf32> -> vector<2x128xf32>
    %c0_3 = arith.constant 0 : index
    %c0_4 = arith.constant 0 : index
    %3 = vector.load %arg4[%c0_3, %c0_4] : memref<1x128xf32, #tpu.memory_space<vmem>>, vector<1x128xf32>
    %4 = vector.broadcast %3 : vector<1x128xf32> to vector<2x128xf32>
    %5 = arith.addf %2, %4 : vector<2x128xf32>
    %c0_5 = arith.constant 0 : index
    %c0_6 = arith.constant 0 : index
    %6 = vector.load %arg5[%c0_5, %c0_6] : memref<2x128xf32, #tpu.memory_space<vmem>>, vector<2x128xf32>
    tpu.vector_store %arg5[%c0_5, %c0_6], %5 {strides = array<i32>} : memref<2x128xf32, #tpu.memory_space<vmem>>, vector<2x128xf32>,
    return
  }
  func.func @transform_0(%arg0: i32, %arg1: i32) -> (i32, i32) {
    %c0_i32 = arith.constant 0 : i32
    %c0_i32_0 = arith.constant 0 : i32
    return %arg1, %c0_i32 : i32, i32
  }
  func.func @transform_1(%arg0: i32, %arg1: i32) -> (i32, i32) {
    %c0_i32 = arith.constant 0 : i32
    %c0_i32_0 = arith.constant 0 : i32
    return %c0_i32, %arg0 : i32, i32
  }
  func.func @transform_2(%arg0: i32, %arg1: i32) -> (i32, i32) {
    %c0_i32 = arith.constant 0 : i32
    %c0_i32_0 = arith.constant 0 : i32
    return %c0_i32, %arg0 : i32, i32
  }
  func.func @transform_3(%arg0: i32, %arg1: i32) -> (i32, i32) {
    %c0_i32 = arith.constant 0 : i32
    return %arg1, %arg0 : i32, i32
  }
}

module attributes {stable_mosaic.version = 11 : i64} {
  func.func @graph_learning_fused_kernel(%arg0: i32, %arg1: i32, %arg2: memref<2x64xbf16, #tpu.memory_space<vmem>>, %arg3: memref<64x128xbf16, #tpu.memory_space<vmem>>, %arg4: memref<1x128xf32, #tpu.memory_space<vmem>>, %arg5: memref<2x128xf32, #tpu.memory_space<vmem>>) attributes {dimension_semantics = [#tpu.dimension_semantics<parallel>, #tpu.dimension_semantics<parallel>], iteration_bounds = array<i64: 1, 1>, scalar_prefetch = 0 : i64, scratch_operands = 0 : i64, tpu.core_type = #tpu.core_type<tc>, window_params = [{transform_indices = @transform_0, window_bounds = array<i64: 2, 64>}, {transform_indices = @transform_1, window_bounds = array<i64: 64, 128>}, {transform_indices = @transform_2, window_bounds = array<i64: 1, 128>}, {transform_indices = @transform_3, window_bounds = array<i64: 2, 128>}]} {
    %c0 = arith.constant 0 : index
    %c0_0 = arith.constant 0 : index
    %0 = vector.load %arg2[%c0, %c0_0] : memref<2x64xbf16, #tpu.memory_space<vmem>>, vector<2x64xbf16>
    %c0_1 = arith.constant 0 : index
    %c0_2 = arith.constant 0 : index
    %1 = vector.load %arg3[%c0_1, %c0_2] : memref<64x128xbf16, #tpu.memory_space<vmem>>, vector<64x128xbf16>
    %cst = arith.constant dense<0.000000e+00> : vector<2x128xf32>
    %2 = tpu.matmul %0, %1, %cst {dimension_numbers = #tpu.dot_dimension_numbers<[1], [0], [0], [1], [0, 0, 1, 1], [], []>} : vector<2x64xbf16>, vector<64x128xbf16>, vector<2x128xf32> -> vector<2x128xf32>
    %c0_3 = arith.constant 0 : index
    %c0_4 = arith.constant 0 : index
    %3 = vector.load %arg4[%c0_3, %c0_4] : memref<1x128xf32, #tpu.memory_space<vmem>>, vector<1x128xf32>
    %4 = vector.broadcast %3 : vector<1x128xf32> to vector<2x128xf32>
    %5 = arith.addf %2, %4 : vector<2x128xf32>
    %c0_5 = arith.constant 0 : index
    %c0_6 = arith.constant 0 : index
    %6 = vector.load %arg5[%c0_5, %c0_6] : memref<2x128xf32, #tpu.memory_space<vmem>>, vector<2x128xf32>
    tpu.vector_store %arg5[%c0_5, %c0_6], %5 {strides = array<i32>} : memref<2x128xf32, #tpu.memory_space<vmem>>, vector<2x128xf32>,
    return
  }
  func.func @transform_0(%arg0: i32, %arg1: i32) -> (i32, i32) {
    %c0_i32 = arith.constant 0 : i32
    %c0_i32_0 = arith.constant 0 : i32
    return %arg1, %c0_i32 : i32, i32
  }
  func.func @transform_1(%arg0: i32, %arg1: i32) -> (i32, i32) {
    %c0_i32 = arith.constant 0 : i32
    %c0_i32_0 = arith.constant 0 : i32
    return %c0_i32, %arg0 : i32, i32
  }
  func.func @transform_2(%arg0: i32, %arg1: i32) -> (i32, i32) {
    %c0_i32 = arith.constant 0 : i32
    %c0_i32_0 = arith.constant 0 : i32
    return %c0_i32, %arg0 : i32, i32
  }
  func.func @transform_3(%arg0: i32, %arg1: i32) -> (i32, i32) {
    %c0_i32 = arith.constant 0 : i32
    return %arg1, %arg0 : i32, i32
  }
}

</mosaic_0001>

<bundles_post_ra>
// kernel: tpu_custom_call.1
= control target key start
LH: loop header
LB: loop body
LE: loop exit
PB: predicated region body
PF: predicated region fallthrough
CT: control target
= control target key end

     0   :  { %8 = vsyncpa [#allocation3], 0  ;;  %s282_s0 = inlined_call_operand.hbm [shape: bf16[2,64], index: 0, kind: input, shape index: {}]   ;;  %s283_s1 = inlined_call_operand.hbm [shape: bf16[64,128], index: 1, kind: input, shape index: {}]   ;;  %s284_s2 = inlined_call_operand.vmem [shape: f32[1,128], index: 2, kind: input, shape index: {}]   ;;  %s285_s3 = inlined_call_operand.hbm [shape: f32[2,128], index: 3, kind: output, shape index: {}]  }
   0x1   :  { %9 = vsyncpa [#allocation6], 0 }
   0x2   :  { %10 = vsyncpa [#allocation4], 0  ;;  %s243_s12 = smov [#allocation2]   ;;  %s244_s14 = smov [#allocation5]  }
   0x3   :  { %s17_s13 = sshll.u32 %s243_s12, 4  ;;  %s26_s15 = sshll.u32 %s244_s14, 4  ;;  %s18_s13 = int_to_ptr.vmem [resolvable:$true] %s17_s13  ;;  %s27_s15 = int_to_ptr.vmem [resolvable:$true] %s26_s15 }
   0x4   :  { %s185_s16 = scalar_lea.vmem %s18_s13, 16  ;;  %s189_s17 = scalar_lea.vmem %s18_s13, 32 }
   0x5   :  { %p186_p0 = scmp.ne.s32.totalorder %s18_s13, %s185_s16  ;;  %p190_p1 = scmp.lt.s32.totalorder %s18_s13, %s18_s13 }
   0x6   :  { %p191_p2 = scmp.lt.s32.totalorder %s189_s17, %s185_s16 }
   0x8   :  { %p192_p3 = por %p191_p2, %p190_p1 }
   0xa   :  { %p193_p4 = pnand %p192_p3, %p186_p0 }
   0xc   :  { %196 = shalt.err (!%p193_p4)
}
   0xd   :  { %20 = dma.hbm_to_vmem [thread:$0]  %s282_s0, 16, %s18_s13, [#allocation3]  }
   0xe   :  { %s205_s20 = scalar_lea.vmem %s27_s15, 512  ;;  %p210_p6 = scmp.lt.s32.totalorder %s27_s15, %s27_s15 }
   0xf   :  { %p206_p5 = scmp.ne.s32.totalorder %s27_s15, %s205_s20  ;;  %p211_p7 = scmp.lt.s32.totalorder %s205_s20, %s205_s20 }
  0x11   :  { %p212_p8 = por %p211_p7, %p210_p6 }
  0x13   :  { %p213_p9 = pnand %p212_p8, %p206_p5 }
  0x15   :  { %216 = shalt.err (!%p213_p9)
}
  0x16   :  { %s245_s21 = smov 64   ;;  %s246_s22 = smov 4  }
  0x17   :  { %32 = dma.hbm_to_vmem [thread:$0]  %s283_s1, 512, %s27_s15, [#allocation6], %s245_s21, %s245_s21, %s246_s22  }
  0x18   :  { %237 = dma.done.wait [#allocation3], 16  }
  0x19   :  { %238 = vsyncadd [#allocation3], 4294967280 }
  0x1a   :  { %239 = dma.done.wait [#allocation6], 512  }
  0x1b   :  { %240 = vsyncadd [#allocation6], 4294966784  ;;  %v247_v0 = vmov 0.0   ;;  %vm248_vm0 = vmmov 0   ;;  %v173_v1 = vld [vmem:[#allocation5 + $0x18] sm:$0xff]   ;;  %v174_v2 = vld [vmem:[#allocation5 + $0x10] sm:$0xff]  }
  0x1c   :  { %154 = vmatprep.subr.bf16.mxu0 %v247_v0  ;;  %162 = vmatprep.mubr.msk.bf16.mxu0 %vm248_vm0, %v247_v0  ;;  %v175_v3 = vld [vmem:[#allocation5 + $0x8] sm:$0xff]   ;;  %v176_v4 = vld [vmem:[#allocation5] sm:$0xff]   ;;  %v42_v5 = vld [vmem:[#allocation2] sm:$0x1]  ;;  %vm82_vm1 = vcmask 523264   ;;  %s249_s25 = smov [#allocation7]  }
  0x1d   :  { %155 = vmatpush3.bf16.msra.mxu0 %v173_v1  ;;  %v143_v6 = vld [vmem:[%s284_s2] ss:$0 sm:$0xff]  ;;  %s133_s26 = sshll.u32 %s249_s25, 4  ;;  %s134_s26 = int_to_ptr.vmem [resolvable:$true] %s133_s26 }
  0x1e   :  { %156 = vmatprep.subr.bf16.mxu0 %v247_v0  ;;  %s217_s27 = scalar_lea.vmem %s134_s26, 32  ;;  %p222_p11 = scmp.lt.s32.totalorder %s134_s26, %s134_s26 }
  0x1f   :  { %p218_p10 = scmp.ne.s32.totalorder %s134_s26, %s217_s27  ;;  %p223_p12 = scmp.lt.s32.totalorder %s217_s27, %s217_s27 }
  0x21   :  { %157 = vmatpush3.bf16.msra.mxu0 %v174_v2  ;;  %p224_p13 = por %p223_p12, %p222_p11 }
  0x22   :  { %158 = vmatprep.subr.bf16.mxu0 %v247_v0 }
  0x23   :  { %p225_p0 = pnand %p224_p13, %p218_p10 }
  0x25   :  { %159 = vmatpush3.bf16.msra.mxu0 %v175_v3 }
  0x26   :  { %160 = vmatprep.subr.bf16.mxu0 %v247_v0 }
  0x29   :  { %161 = vmatpush3.bf16.msra.mxu0 %v176_v4 }
  0x2c   :  { %163 = vmatmul.mubr.msk.bf16.vlgmr.msra.gmra.mxu0 %vm82_vm1, %v42_v5 }
  0xec   :  { %v120_v7 = vpop.f32.mrf.mxu0 }
  0xed   :  { %v121_v8 = vadd.f32 %v143_v6, %v120_v7 }
  0xee   :  { %v164_v9 = vpop.f32.mrf.mxu0 }
  0xef   :  { %126 = vst [vmem:[#allocation7] sm:$0x3] %v121_v8 }
  0xf0   :  { %v123_v10 = vpop.f32.mrf.mxu0 }
  0xf1   :  { %228 = shalt.err (!%p225_p0)
}
  0xf2   :  { %136 = dma.vmem_to_hbm [thread:$0]  %s134_s26, 32, %s285_s3, [#allocation4]   ;;  %v165_v11 = vpop.f32.mrf.mxu0 }
  0xf3   :  { %241 = dma.done.wait [#allocation4], 32  }
  0xf4   :  { %242 = vsyncadd [#allocation4], 4294967264 }
  0xf5   :  { %140 = vsyncpa [#allocation3], 1 }
  0xf6   :  { %141 = vsyncpa [#allocation6], 1 }
  0xf7   :  { %142 = vsyncpa [#allocation4], 1 }

// kernel: tpu_custom_call.1
= control target key start
LH: loop header
LB: loop body
LE: loop exit
PB: predicated region body
PF: predicated region fallthrough
CT: control target
= control target key end

     0   :  { %8 = vsyncpa [#allocation3], 0  ;;  %s282_s0 = inlined_call_operand.hbm [shape: bf16[2,64], index: 0, kind: input, shape index: {}]   ;;  %s283_s1 = inlined_call_operand.hbm [shape: bf16[64,128], index: 1, kind: input, shape index: {}]   ;;  %s284_s2 = inlined_call_operand.vmem [shape: f32[1,128], index: 2, kind: input, shape index: {}]   ;;  %s285_s3 = inlined_call_operand.hbm [shape: f32[2,128], index: 3, kind: output, shape index: {}]  }
   0x1   :  { %9 = vsyncpa [#allocation6], 0 }
   0x2   :  { %10 = vsyncpa [#allocation4], 0  ;;  %s243_s12 = smov [#allocation2]   ;;  %s244_s14 = smov [#allocation5]  }
   0x3   :  { %s17_s13 = sshll.u32 %s243_s12, 4  ;;  %s26_s15 = sshll.u32 %s244_s14, 4  ;;  %s18_s13 = int_to_ptr.vmem [resolvable:$true] %s17_s13  ;;  %s27_s15 = int_to_ptr.vmem [resolvable:$true] %s26_s15 }
   0x4   :  { %s185_s16 = scalar_lea.vmem %s18_s13, 16  ;;  %s189_s17 = scalar_lea.vmem %s18_s13, 32 }
   0x5   :  { %p186_p0 = scmp.ne.s32.totalorder %s18_s13, %s185_s16  ;;  %p190_p1 = scmp.lt.s32.totalorder %s18_s13, %s18_s13 }
   0x6   :  { %p191_p2 = scmp.lt.s32.totalorder %s189_s17, %s185_s16 }
   0x8   :  { %p192_p3 = por %p191_p2, %p190_p1 }
   0xa   :  { %p193_p4 = pnand %p192_p3, %p186_p0 }
   0xc   :  { %196 = shalt.err (!%p193_p4)
}
   0xd   :  { %20 = dma.hbm_to_vmem [thread:$0]  %s282_s0, 16, %s18_s13, [#allocation3]  }
   0xe   :  { %s205_s20 = scalar_lea.vmem %s27_s15, 512  ;;  %p210_p6 = scmp.lt.s32.totalorder %s27_s15, %s27_s15 }
   0xf   :  { %p206_p5 = scmp.ne.s32.totalorder %s27_s15, %s205_s20  ;;  %p211_p7 = scmp.lt.s32.totalorder %s205_s20, %s205_s20 }
  0x11   :  { %p212_p8 = por %p211_p7, %p210_p6 }
  0x13   :  { %p213_p9 = pnand %p212_p8, %p206_p5 }
  0x15   :  { %216 = shalt.err (!%p213_p9)
}
  0x16   :  { %s245_s21 = smov 64   ;;  %s246_s22 = smov 4  }
  0x17   :  { %32 = dma.hbm_to_vmem [thread:$0]  %s283_s1, 512, %s27_s15, [#allocation6], %s245_s21, %s245_s21, %s246_s22  }
  0x18   :  { %237 = dma.done.wait [#allocation3], 16  }
  0x19   :  { %238 = vsyncadd [#allocation3], 4294967280 }
  0x1a   :  { %239 = dma.done.wait [#allocation6], 512  }
  0x1b   :  { %240 = vsyncadd [#allocation6], 4294966784  ;;  %v247_v0 = vmov 0.0   ;;  %vm248_vm0 = vmmov 0   ;;  %v173_v1 = vld [vmem:[#allocation5 + $0x18] sm:$0xff]   ;;  %v174_v2 = vld [vmem:[#allocation5 + $0x10] sm:$0xff]  }
  0x1c   :  { %154 = vmatprep.subr.bf16.mxu0 %v247_v0  ;;  %162 = vmatprep.mubr.msk.bf16.mxu0 %vm248_vm0, %v247_v0  ;;  %v175_v3 = vld [vmem:[#allocation5 + $0x8] sm:$0xff]   ;;  %v176_v4 = vld [vmem:[#allocation5] sm:$0xff]   ;;  %v42_v5 = vld [vmem:[#allocation2] sm:$0x1]  ;;  %vm82_vm1 = vcmask 523264   ;;  %s249_s25 = smov [#allocation7]  }
  0x1d   :  { %155 = vmatpush3.bf16.msra.mxu0 %v173_v1  ;;  %v143_v6 = vld [vmem:[%s284_s2] ss:$0 sm:$0xff]  ;;  %s133_s26 = sshll.u32 %s249_s25, 4  ;;  %s134_s26 = int_to_ptr.vmem [resolvable:$true] %s133_s26 }
  0x1e   :  { %156 = vmatprep.subr.bf16.mxu0 %v247_v0  ;;  %s217_s27 = scalar_lea.vmem %s134_s26, 32  ;;  %p222_p11 = scmp.lt.s32.totalorder %s134_s26, %s134_s26 }
  0x1f   :  { %p218_p10 = scmp.ne.s32.totalorder %s134_s26, %s217_s27  ;;  %p223_p12 = scmp.lt.s32.totalorder %s217_s27, %s217_s27 }
  0x21   :  { %157 = vmatpush3.bf16.msra.mxu0 %v174_v2  ;;  %p224_p13 = por %p223_p12, %p222_p11 }
  0x22   :  { %158 = vmatprep.subr.bf16.mxu0 %v247_v0 }
  0x23   :  { %p225_p0 = pnand %p224_p13, %p218_p10 }
  0x25   :  { %159 = vmatpush3.bf16.msra.mxu0 %v175_v3 }
  0x26   :  { %160 = vmatprep.subr.bf16.mxu0 %v247_v0 }
  0x29   :  { %161 = vmatpush3.bf16.msra.mxu0 %v176_v4 }
  0x2c   :  { %163 = vmatmul.mubr.msk.bf16.vlgmr.msra.gmra.mxu0 %vm82_vm1, %v42_v5 }
  0xec   :  { %v120_v7 = vpop.f32.mrf.mxu0 }
  0xed   :  { %v121_v8 = vadd.f32 %v143_v6, %v120_v7 }
  0xee   :  { %v164_v9 = vpop.f32.mrf.mxu0 }
  0xef   :  { %126 = vst [vmem:[#allocation7] sm:$0x3] %v121_v8 }
  0xf0   :  { %v123_v10 = vpop.f32.mrf.mxu0 }
  0xf1   :  { %228 = shalt.err (!%p225_p0)
}
  0xf2   :  { %136 = dma.vmem_to_hbm [thread:$0]  %s134_s26, 32, %s285_s3, [#allocation4]   ;;  %v165_v11 = vpop.f32.mrf.mxu0 }
  0xf3   :  { %241 = dma.done.wait [#allocation4], 32  }
  0xf4   :  { %242 = vsyncadd [#allocation4], 4294967264 }
  0xf5   :  { %140 = vsyncpa [#allocation3], 1 }
  0xf6   :  { %141 = vsyncpa [#allocation6], 1 }
  0xf7   :  { %142 = vsyncpa [#allocation4], 1 }

</bundles_post_ra>
